<compile_context>
chip_gen: v7x
topology: tpu7x:2x2x1
jax: 0.10.0
libtpu: 0.0.40
codegen_flags: <defaults>
</compile_context>

<pallas_src>
import jax
import jax.numpy as jnp
from jax.experimental import pallas as pl
from jax.experimental.pallas import tpu as pltpu


# ---------------------------------------------------------------------------
# Small helpers
# ---------------------------------------------------------------------------
def _round_up(n, m):
    return ((n + m - 1) // m) * m


def _pick_hw_block(hw, max_block=4096):
    """Largest lane-aligned HW tile keeping zero-padding waste small (<~12.5%)."""
    hw128 = _round_up(hw, 128)
    if hw128 <= max_block:
        return hw128
    for cand in (4096, 2048, 1024, 512, 256):
        if cand <= max_block and _round_up(hw, cand) - hw128 <= hw128 // 8:
            return cand
    return 128


def _vmem_limit_bytes(cin, cout, hw_blk, out_itemsize):
    """Scoped-VMEM limit derived from the actual double-buffered tiles."""
    streamed = 2 * (cin * hw_blk * 2 + cout * hw_blk * out_itemsize)   # x + y, 2-deep
    resident = cout * cin * 2 + 2 * cout * 4 * 128 + cin * 128 * 4     # w, bias/gate, |x| acc
    est = 2 * (streamed + resident)        # 2x headroom for compiler scratch
    return int(min(max(est, 16 << 20), 48 << 20))   # stay well under v7x's 64 MiB


def _abs_lane_fold(x_tile):
    """|x| folded onto a lane-dense (C, 128) carrier.

    Uses static 128-aligned lane slices + VALU adds only: no cross-lane XLU
    reduce and no last-dim-1 masked stores.
    """
    xa = jnp.abs(x_tile.astype(jnp.float32))
    c, blk = xa.shape
    acc = xa[:, :128]
    for j in range(1, blk // 128):
        acc = acc + xa[:, j * 128:(j + 1) * 128]
    return acc


# ---------------------------------------------------------------------------
# Kernel bodies
# ---------------------------------------------------------------------------
def _conv_kernel(x_ref, wc_ref, bc_ref, y_ref):
    # x: (Cin, hw_blk) bf16, wc: (Cout, Cin) bf16, bc: (Cout, 1) f32
    y = jnp.dot(wc_ref[...], x_ref[...], preferred_element_type=jnp.float32)
    y_ref[...] = (y + bc_ref[...]).astype(y_ref.dtype)


def _conv_scale_kernel(x_ref, wc_ref, bc_ref, t_ref, y_ref):
    # Conv + per-(batch, out-channel) gate scale; (Cout,1) lane-broadcasts.
    y = jnp.dot(wc_ref[...], x_ref[...], preferred_element_type=jnp.float32)
    y_ref[...] = ((y + bc_ref[...]) * t_ref[...]).astype(y_ref.dtype)


def _abs_sum_kernel(x_ref, s_ref):
    # grid = (B, n_outer, n_inner); s_ref (Cin, 128) is resident over the
    # innermost (arbitrary) axis.
    @pl.when(pl.program_id(2) == 0)
    def _init():
        s_ref[...] = jnp.zeros_like(s_ref)

    s_ref[...] += _abs_lane_fold(x_ref[...])


def _conv_abssum_kernel(x_ref, wc_ref, bc_ref, y_ref, s_ref):
    # Fused path (Cin > 2*Cout): one HBM read of x produces unscaled y and the
    # lane-dense |x| partial sums. grid = (B, n_hw); HW axis is the reduction.
    @pl.when(pl.program_id(1) == 0)
    def _init():
        s_ref[...] = jnp.zeros_like(s_ref)

    x = x_ref[...]
    s_ref[...] += _abs_lane_fold(x)
    y = jnp.dot(wc_ref[...], x, preferred_element_type=jnp.float32)
    y_ref[...] = (y + bc_ref[...]).astype(y_ref.dtype)


# ---------------------------------------------------------------------------
# Gate (tiny O(B*Cin*Cout) math, left to XLA as sanctioned by the review)
# ---------------------------------------------------------------------------
def _gate_scales(s_mean, wg, bg, k, cout):
    g = jnp.maximum(s_mean @ wg.T + bg[None, :], 0.0)        # (B, Cout)
    # Zero the k smallest gates per row (stable ascending rank -> ties resolve
    # to the lower index, like a stable sort), then renormalize to sum Cout.
    ranks = jnp.argsort(jnp.argsort(g, axis=1), axis=1)
    t = jnp.where(ranks < k, 0.0, g)
    # NOTE: NaN if every surviving gate is exactly 0 — matches the torch module.
    return t / jnp.sum(t, axis=1, keepdims=True) * jnp.float32(cout)


# ---------------------------------------------------------------------------
# Forward wrapper
# ---------------------------------------------------------------------------
def channel_pruning_forward(x_nchw, wc, bc, wg, bg, *, rate,
                            hw_block=None, out_dtype=jnp.float32):
    """ChannelPruning forward (eval mode).

    x_nchw: (B, Cin, H, W) f32
    wc    : (Cout, Cin)  1x1 conv weight     bc: (Cout,) conv bias
    wg    : (Cout, Cin)  gate Linear weight  bg: (Cout,) gate bias
    Returns (B, Cout, H, W) in `out_dtype` (default f32; bf16 allowed when the
    consumer tolerates it — halves the written HBM bytes).
    Conv uses bf16 MXU inputs with f32 accumulation (documented deviation from
    the f32 torch conv); gate math stays f32.
    """
    B, Cin, H, W = x_nchw.shape
    Cout = wc.shape[0]
    HW = H * W
    k = int(Cout * (1.0 - rate))          # matches torch int() truncation

    hw_blk = hw_block if hw_block is not None else _pick_hw_block(HW)
    assert hw_blk % 128 == 0, "hw_block must be a multiple of 128 lanes"
    HW_pad = _round_up(HW, hw_blk)
    n_hw = HW_pad // hw_blk

    # Single materializing pass over x: the NCHW->(B,Cin,HW) reshape is a view;
    # the bf16 cast (halves streamed HBM bytes in both kernels) and the zero-pad
    # of the HW tail fuse into one XLA copy.  Zero pads add 0 to the |x| sums.
    x_flat = x_nchw.reshape(B, Cin, HW).astype(jnp.bfloat16)
    if HW_pad != HW:
        x_flat = jnp.pad(x_flat, ((0, 0), (0, 0), (0, HW_pad - HW)))

    wc_bf = wc.astype(jnp.bfloat16)       # pre-cast once; no per-step VPU cast
    bc_col = bc.reshape(Cout, 1).astype(jnp.float32)

    vmem_limit = _vmem_limit_bytes(Cin, Cout, hw_blk, jnp.dtype(out_dtype).itemsize)

    # Grid-invariant operands (wc, bc, t) are tiny, so default double-buffering
    # is harmless; pipeline_mode=pl.Buffered(1) would single-buffer them if
    # VMEM ever became tight.
    x_spec = pl.BlockSpec((None, Cin, hw_blk), lambda b, h: (b, 0, h))
    wc_spec = pl.BlockSpec((Cout, Cin), lambda b, h: (0, 0))
    bc_spec = pl.BlockSpec((Cout, 1), lambda b, h: (0, 0))
    y_spec = pl.BlockSpec((None, Cout, hw_blk), lambda b, h: (b, 0, h))
    y_shape = jax.ShapeDtypeStruct((B, Cout, HW_pad), out_dtype)

    if k <= 0:
        # rate = 1.0 (module default): gate disabled, pure 1x1 conv.
        y_flat = pl.pallas_call(
            _conv_kernel,
            out_shape=y_shape,
            grid=(B, n_hw),
            in_specs=[x_spec, wc_spec, bc_spec],
            out_specs=y_spec,
            compiler_params=pltpu.CompilerParams(
                dimension_semantics=("parallel", "parallel"),
                vmem_limit_bytes=vmem_limit),
        )(x_flat, wc_bf, bc_col)
    elif Cin > 2 * Cout:
        # Projection-style layer: fuse the |x| reduction into the conv pass so
        # x is read once (traffic Cin*HW + 3*Cout*HW vs 2*Cin*HW + Cout*HW);
        # the gate is then a cheap elementwise rescale of y (left to XLA: a
        # trivially mem-bound broadcast multiply fused with the un-pad slice).
        y_unscaled, s_part = pl.pallas_call(
            _conv_abssum_kernel,
            out_shape=(y_shape,
                       jax.ShapeDtypeStruct((B, Cin, 128), jnp.float32)),
            grid=(B, n_hw),
            in_specs=[x_spec, wc_spec, bc_spec],
            out_specs=(y_spec,
                       pl.BlockSpec((None, Cin, 128), lambda b, h: (b, 0, 0))),
            compiler_params=pltpu.CompilerParams(
                dimension_semantics=("parallel", "arbitrary"),
                vmem_limit_bytes=vmem_limit),
        )(x_flat, wc_bf, bc_col)
        s_mean = s_part.sum(axis=-1) * (1.0 / HW)             # (B, Cin)
        t = _gate_scales(s_mean, wg, bg, k, Cout)
        y_flat = y_unscaled * t.astype(out_dtype)[:, :, None]
    else:
        # Expansion-style layer (Cin <= 2*Cout): two passes over x beat
        # re-reading y.  Pass 1: lane-dense |x| partial sums; the HW axis gets
        # an extra *parallel* split so both v7x TensorCores stay busy even at
        # B == 1; the tiny (n_outer, 128) collapse finishes in XLA.
        n_outer = 2 if (n_hw % 2 == 0 and n_hw >= 2) else 1
        n_inner = n_hw // n_outer
        s_part = pl.pallas_call(
            _abs_sum_kernel,
            out_shape=jax.ShapeDtypeStruct((B, n_outer, Cin, 128), jnp.float32),
            grid=(B, n_outer, n_inner),
            in_specs=[pl.BlockSpec((None, Cin, hw_blk),
                                   lambda b, o, i: (b, 0, o * n_inner + i))],
            out_specs=pl.BlockSpec((None, None, Cin, 128),
                                   lambda b, o, i: (b, o, 0, 0)),
            compiler_params=pltpu.CompilerParams(
                dimension_semantics=("parallel", "parallel", "arbitrary"),
                vmem_limit_bytes=vmem_limit),
        )(x_flat)
        s_mean = s_part.sum(axis=(1, 3)) * (1.0 / HW)          # (B, Cin)
        t = _gate_scales(s_mean, wg, bg, k, Cout)
        t_col = t.reshape(B, Cout, 1)
        # Pass 2: 1x1 conv (channels-major, HW lane-dense) + per-channel scale.
        y_flat = pl.pallas_call(
            _conv_scale_kernel,
            out_shape=y_shape,
            grid=(B, n_hw),
            in_specs=[x_spec, wc_spec, bc_spec,
                      pl.BlockSpec((None, Cout, 1), lambda b, h: (b, 0, 0))],
            out_specs=y_spec,
            compiler_params=pltpu.CompilerParams(
                dimension_semantics=("parallel", "parallel"),
                vmem_limit_bytes=vmem_limit),
        )(x_flat, wc_bf, bc_col, t_col)

    # TODO(synk): training-mode side effect self.loss = ||g||_1 is a module
    # attribute, not a forward output; only the eval path (loss=None) is built.

    if HW_pad != HW:
        y_flat = y_flat[:, :, :HW]
    return y_flat.reshape(B, Cout, H, W)


# ---------------------------------------------------------------------------
# Pure-JAX reference mirroring the PyTorch forward (eval mode).
# The conv mirrors the kernels' bf16-input / f32-accumulate MXU numerics and
# the |x| statistics are taken from the same bf16 view of x; gate math is f32.
# ---------------------------------------------------------------------------
def _reference_forward(x_nchw, wc, bc, wg, bg, *, rate):
    B, Cin, H, W = x_nchw.shape
    Cout = wc.shape[0]
    xb = x_nchw.reshape(B, Cin, H * W).astype(jnp.bfloat16)
    y = jnp.einsum("oc,bcs->bos", wc.astype(jnp.bfloat16), xb,
                   preferred_element_type=jnp.float32)
    y = y + bc[None, :, None]
    k = int(Cout * (1.0 - rate))
    if k > 0:
        s = jnp.mean(jnp.abs(xb.astype(jnp.float32)), axis=-1)   # (B, Cin)
        g = jnp.maximum(s @ wg.T + bg[None, :], 0.0)             # (B, Cout)
        idx = jnp.argsort(g, axis=1)[:, :k]                      # k smallest (stable)
        t = g.at[jnp.arange(B)[:, None], idx].set(0.0)
        t = t / jnp.sum(t, axis=1, keepdims=True) * Cout
        y = y * t[:, :, None]
    return y.reshape(B, Cout, H, W)


if __name__ == "__main__":
    key = jax.random.PRNGKey(0)

    def make_params(k, cin, cout):
        k_wc, k_bc, k_wg = jax.random.split(k, 3)
        wc = jax.random.normal(k_wc, (cout, cin), jnp.float32) * (2.0 / cin) ** 0.5
        bc = jax.random.normal(k_bc, (cout,), jnp.float32) * 0.1
        # gate = Linear(Cin, Cout): kaiming_normal weight, bias = 1 (torch init).
        wg = jax.random.normal(k_wg, (cout, cin), jnp.float32) * (2.0 / cin) ** 0.5
        bg = jnp.ones((cout,), jnp.float32)
        return wc, bc, wg, bg

    def check(name, x, params, rate, **kw):
        wc, bc, wg, bg = params
        y = jax.block_until_ready(
            channel_pruning_forward(x, wc, bc, wg, bg, rate=rate, **kw))
        y_ref = _reference_forward(x, wc, bc, wg, bg, rate=rate)
        assert y.shape == y_ref.shape, f"shape mismatch: {name}"
        assert jnp.allclose(y, y_ref, atol=5e-3, rtol=5e-3), f"value mismatch: {name}"

    k0, k1, k2, k3 = jax.random.split(key, 4)

    # Expansion-style (Cin <= 2*Cout): two-pass path, 2 HW tiles, pruning on.
    x1 = jax.random.normal(k0, (2, 8, 16, 16), jnp.float32)
    p1 = make_params(k1, 8, 16)
    check("expansion/pruned", x1, p1, rate=0.5, hw_block=128)

    # Module default rate=1.0 -> k=0, gate disabled (conv-only path).
    check("expansion/rate=1", x1, p1, rate=1.0)

    # Projection-style (Cin > 2*Cout): fused conv + |x| reduction path.
    x2 = jax.random.normal(k2, (2, 64, 16, 16), jnp.float32)
    p2 = make_params(k3, 64, 16)
    check("projection/pruned", x2, p2, rate=0.5, hw_block=128)

    # Non-128-divisible spatial size (like MobileNet 7x7/14x14 maps): padded HW.
    x3 = jax.random.normal(k0, (2, 8, 10, 10), jnp.float32)
    check("padded-HW/pruned", x3, p1, rate=0.5)

    print("KERNEL_OK")
</pallas_src>

<mosaic_0001>
module attributes {stable_mosaic.version = 11 : i64} {
  func.func @_abs_sum_kernel(%arg0: i32, %arg1: i32, %arg2: i32, %arg3: memref<1x8x128xbf16, #tpu.memory_space<vmem>>, %arg4: memref<1x1x8x128xf32, #tpu.memory_space<vmem>>) attributes {dimension_semantics = [#tpu.dimension_semantics<parallel>, #tpu.dimension_semantics<parallel>, #tpu.dimension_semantics<arbitrary>], iteration_bounds = array<i64: 2, 2, 1>, scalar_prefetch = 0 : i64, scratch_operands = 0 : i64, tpu.core_type = #tpu.core_type<tc>, window_params = [{transform_indices = @transform_0, window_bounds = array<i64: 1, 8, 128>}, {transform_indices = @transform_1, window_bounds = array<i64: 1, 1, 8, 128>}]} {
    %c0_i32 = arith.constant 0 : i32
    %0 = arith.cmpi eq, %arg2, %c0_i32 : i32
    %1 = arith.extui %0 : i1 to i32
    %c0_i32_0 = arith.constant 0 : i32
    %2 = arith.cmpi ne, %1, %c0_i32_0 : i32
    scf.if %2 {
      %cst = arith.constant 0.000000e+00 : f32
      %13 = vector.broadcast %cst : f32 to vector<8x128xf32>
      %c0_11 = arith.constant 0 : index
      %c0_12 = arith.constant 0 : index
      %c0_13 = arith.constant 0 : index
      %c0_14 = arith.constant 0 : index
      %14 = vector.load %arg4[%c0_11, %c0_12, %c0_13, %c0_14] : memref<1x1x8x128xf32, #tpu.memory_space<vmem>>, vector<1x1x8x128xf32>
      %15 = vector.shape_cast %14 : vector<1x1x8x128xf32> to vector<8x128xf32>
      %16 = vector.shape_cast %13 : vector<8x128xf32> to vector<1x1x8x128xf32>
      tpu.vector_store %arg4[%c0_11, %c0_12, %c0_13, %c0_14], %16 {strides = array<i32>} : memref<1x1x8x128xf32, #tpu.memory_space<vmem>>, vector<1x1x8x128xf32>,
    } else {
    }
    %c0 = arith.constant 0 : index
    %c0_1 = arith.constant 0 : index
    %c0_2 = arith.constant 0 : index
    %c0_3 = arith.constant 0 : index
    %3 = vector.load %arg4[%c0, %c0_1, %c0_2, %c0_3] : memref<1x1x8x128xf32, #tpu.memory_space<vmem>>, vector<1x1x8x128xf32>
    %4 = vector.shape_cast %3 : vector<1x1x8x128xf32> to vector<8x128xf32>
    %c0_4 = arith.constant 0 : index
    %c0_5 = arith.constant 0 : index
    %c0_6 = arith.constant 0 : index
    %5 = vector.load %arg3[%c0_4, %c0_5, %c0_6] : memref<1x8x128xbf16, #tpu.memory_space<vmem>>, vector<1x8x128xbf16>
    %6 = vector.shape_cast %5 : vector<1x8x128xbf16> to vector<8x128xbf16>
    %7 = arith.extf %6 : vector<8x128xbf16> to vector<8x128xf32>
    %8 = math.absf %7 : vector<8x128xf32>
    %9 = arith.addf %4, %8 : vector<8x128xf32>
    %c0_7 = arith.constant 0 : index
    %c0_8 = arith.constant 0 : index
    %c0_9 = arith.constant 0 : index
    %c0_10 = arith.constant 0 : index
    %10 = vector.load %arg4[%c0_7, %c0_8, %c0_9, %c0_10] : memref<1x1x8x128xf32, #tpu.memory_space<vmem>>, vector<1x1x8x128xf32>
    %11 = vector.shape_cast %10 : vector<1x1x8x128xf32> to vector<8x128xf32>
    %12 = vector.shape_cast %9 : vector<8x128xf32> to vector<1x1x8x128xf32>
    tpu.vector_store %arg4[%c0_7, %c0_8, %c0_9, %c0_10], %12 {strides = array<i32>} : memref<1x1x8x128xf32, #tpu.memory_space<vmem>>, vector<1x1x8x128xf32>,
    return
  }
  func.func @transform_0(%arg0: i32, %arg1: i32, %arg2: i32) -> (i32, i32, i32) {
    %c1_i32 = arith.constant 1 : i32
    %0 = arith.muli %arg1, %c1_i32 : i32
    %1 = arith.addi %0, %arg2 : i32
    %c0_i32 = arith.constant 0 : i32
    %c0_i32_0 = arith.constant 0 : i32
    return %arg0, %c0_i32, %1 : i32, i32, i32
  }
  func.func @transform_1(%arg0: i32, %arg1: i32, %arg2: i32) -> (i32, i32, i32, i32) {
    %c0_i32 = arith.constant 0 : i32
    %c0_i32_0 = arith.constant 0 : i32
    %c0_i32_1 = arith.constant 0 : i32
    return %arg0, %arg1, %c0_i32, %c0_i32_0 : i32, i32, i32, i32
  }
}

</mosaic_0001>

<bundles_post_ra>
// kernel: tpu_custom_call.1
= control target key start
LH: loop header
LB: loop body
LE: loop exit
PB: predicated region body
PF: predicated region fallthrough
CT: control target
= control target key end

     0   :  { %6 = vsyncpa [#allocation3], 0  ;;  %s708_s0 = inlined_call_operand.hbm [shape: bf16[2,8,256], index: 0, kind: input, shape index: {}]   ;;  %s709_s1 = inlined_call_operand.hbm [shape: f32[2,2,8,128], index: 1, kind: output, shape index: {}]  }
   0x1   :  { %8 = vsyncpa [#allocation3 + $0x1], 0 }
   0x2   :  { %9 = vsyncpa [#allocation4], 0 }
   0x3   :  { %11 = vsyncpa [#allocation4 + $0x1], 0  ;;  %s513_s6 = smov 0   ;;  %s515_s7 = smov 0  }
   0x4   :  { %s517_s8 = smov 0   ;;  %s519_s9 = smov 0  }
   0x5   :  { %s521_s10 = smov 0   ;;  %s523_s11 = smov 0  }
   0x6   :  { %s525_s12 = smov 0   ;;  %s527_s13 = smov 0  }
   0x7 LB: > { %s277_s14 = sadd.s32 4294967295, %s499_s13   ;;  %s278_s15 = sadd.s32 4294967294, %s499_s13   ;;  %s499_s13 = sphi %s527_s13, %s17_s13   ;;  %s495_s12 = sphi %s525_s12, %s726_s12   ;;  %s491_s11 = sphi %s523_s11, %s725_s11   ;;  %s487_s10 = sphi %s521_s10, %s724_s10   ;;  %s483_s9 = sphi %s519_s9, %s723_s9   ;;  %s479_s8 = sphi %s517_s8, %s722_s8   ;;  %s475_s7 = sphi %s515_s7, %s721_s7   ;;  %s471_s6 = sphi %s513_s6, %s720_s6  }
   0x8   : > { %s32_s16 = sadd.s32 1, %s491_s11  ;;  %s36_s17 = sadd.s32 1, %s495_s12 }
   0x9   : > { %p34_p0 = scmp.ge.s32.totalorder %s32_s16, 2  ;;  %s47_s18 = sadd.s32 1, %s479_s8 }
   0xa   : > { %p54_p1 = scmp.ne.s32.totalorder %s479_s8, %s475_s7  ;;  %p55_p2 = scmp.eq.s32.totalorder %s499_s13, 0 }
   0xb   : > { %s728_s16 = smov (%p34_p0, %s32_s16), 0  ;;  %s730_s17 = smov (!%p34_p0, %s36_s17), %s495_s12 }
   0xc   : > { %s43_s19 = ssub.s32 %s491_s11, %s728_s16  ;;  %p566_p3 = por %p55_p2, %p54_p1 }
   0xd   : > { %p38_p4 = scmp.ge.s32.totalorder %s730_s17, 2  ;;  %p60_p5 = scmp.ne.s32.totalorder %s475_s7, %s471_s6 }
   0xe   : > { %p61_p6 = scmp.eq.s32.totalorder %s277_s14, 0  ;;  %p86_p7 = scmp.eq.s32.totalorder %s277_s14, 3 }
   0xf   : > { %s732_s17 = smov (%p38_p4, %s730_s17), 0  ;;  %p92_p10 = scmp.eq.s32.totalorder %s278_s15, 3 }
  0x10   : > { %p574_p8 = por %p61_p6, %p60_p5  ;;  %p578_p9 = por %p86_p7, %p54_p1 }
  0x11   : > { %s42_s23 = ssub.s32 %s495_s12, %s732_s17  ;;  %p584_p12 = por %p92_p10, %p60_p5 }
  0x12   : > { %s713_s22 = scalar_select %p578_p9, 1, 0 }
  0x13   : > { %s44_s24 = sor.u32 %s43_s19, %s42_s23  ;;  %p304_p13 = scmp.lt.s32.totalorder %s499_s13, 4 }
  0x14   : > { %p45_p11 = scmp.eq.s32.totalorder %s44_s24, 0  ;;  %s112_s26 = sand.u32 1, %s479_s8  }
  0x15   : > { %s714_s25 = scalar_select %p584_p12, 1, 0 }
  0x16   : > { %s591_s27 = scalar_select %p45_p11, %s479_s8, %s47_s18  }
  0x17   : > { %s281_s28 = sshll.u32 %s112_s26, 2  ;;  %s282_s29 = sshll.u32 %s495_s12, 1 }
  0x18   : > { %s122_s30 = sadd.s32 %s491_s11, %s282_s29  ;;  %s116_s2 = scalar_lea.vmem [#allocation2], %s281_s28 }
  0x19   : > { %s126_s3 = sshll.u32 %s116_s2, 4  ;;  %s283_s4 = sshll.u32 %s122_s30, 6  ;;  %s595_s3 = int_to_ptr.vmem [resolvable:$true] %s126_s3 }
  0x1a   : > { %s600_s15 = scalar_lea.hbm %s708_s0, %s283_s4  ;;  %p604_p0 = pnand %p304_p13, %p566_p3 }
  0x1b   : > { %s113_s19 = scalar_lea.sflag [#allocation3], %s112_s26  ;;  %s371_s23 = scalar_lea.hbm %s600_s15, 64 }
  0x1c   : > { %p372_p4 = scmp.ne.s32.totalorder %s600_s15, %s371_s23  ;;  %p373_p5 = pneg %p604_p0 }
  0x1d   : > { %s376_s28 = scalar_lea.hbm %s708_s0, 256  ;;  %p377_p3 = scmp.lt.u32.totalorder %s600_s15, %s708_s0 }
  0x1e   : > { %p374_p6 = pnand %p373_p5, %p372_p4  ;;  %p378_p10 = scmp.lt.u32.totalorder %s376_s28, %s371_s23 }
  0x1f   : > { %p380_p13 = scmp.lt.u32.totalorder %s371_s23, %s600_s15 }
  0x20   : > { %p375_p7 = pneg %p374_p6  ;;  %p379_p11 = por %p378_p10, %p377_p3 }
  0x22   : > { %p381_p1 = por %p380_p13, %p379_p11 }
  0x24   : > { %p382_p2 = pnand %p381_p1, %p375_p7 }
  0x26   : > { %385 = shalt.err (!%p382_p2)
}
  0x27   : > { %s386_s26 = scalar_lea.vmem %s595_s3, 64  ;;  %s501_s2 = smov [#allocation2]  }
  0x28   : > { %p387_p4 = scmp.ne.s32.totalorder %s595_s3, %s386_s26  ;;  %s391_s4 = sshll.u32 %s501_s2, 4  ;;  %s392_s4 = int_to_ptr.vmem [resolvable:$false] %s391_s4 }
  0x29   : > { %s393_s5 = scalar_lea.vmem %s392_s4, 128  ;;  %p394_p9 = scmp.lt.s32.totalorder %s595_s3, %s392_s4 }
  0x2a   : > { %p389_p6 = pnand %p387_p4, %p373_p5  ;;  %p395_p3 = scmp.lt.s32.totalorder %s393_s5, %s386_s26 }
  0x2c   : > { %p390_p12 = pneg %p389_p6  ;;  %p396_p10 = por %p395_p3, %p394_p9 }
  0x2e   : > { %p397_p11 = pnand %p396_p10, %p390_p12 }
  0x30   : > { %400 = shalt.err (!%p397_p11)
}
  0x31   : > { %299 = dma.hbm_to_vmem [thread:$0]  (!%p604_p0), %s600_s15, 64, %s595_s3, %s113_s19  }
  0x32   : > { %p716_p1 = scmp.lt.s32.totalorder %s499_s13, 5  ;;  %p717_p2 = scmp.ge.s32.totalorder %s499_s13, 1 }
  0x34   : > { %p132_p5 = pnand %p717_p2, %p716_p1 }
  0x35   : > { %s640_s14 = sand.u32 (!%p132_p5), 1, %s475_s7  }
  0x36   : > { %135 = sbr.rel (%p132_p5) target bundleno = 89 (0x59), region = 24  ;;  %s285_s23 = sshll.u32 (!%p132_p5), %s640_s14, 2 }
  0x37   : > { %s138_s20 = scalar_lea.sflag (!%p132_p5), [#allocation3], %s640_s14  ;;  %s141_s24 = scalar_lea.vmem (!%p132_p5), [#allocation2], %s285_s23 }
  0x3d   : > { %462 = dma.done.wait (%p574_p8), %s138_s20, 64  }
  0x3e   : > { %464 = vsyncadd (%p574_p8), %s138_s20, 4294967232  ;;  %s286_s3 = sshll.u32 %s640_s14, 3  ;;  %s288_s15 = sshll.u32 %s487_s10, 1  ;;  %v167_v0 = vld [vmem:[%s141_s24] sm:$0xf] }
  0x3f   : > { %s184_s18 = sadd.s32 %s483_s9, %s288_s15  ;;  %v168_v1 = vunpack.c.l.bf16 %v167_v0  ;;  %s159_s28 = scalar_lea.vmem [#allocation5], %s286_s3 }
  0x40   : > { %s289_s19 = sshll.u32 %s184_s18, 7  ;;  %s188_s29 = sshll.u32 %s159_s28, 4  ;;  %s656_s29 = int_to_ptr.vmem [resolvable:$true] %s188_s29 }
  0x41   : > { %v169_v2 = vand.u32 2147483647, %v168_v1  ;;  %s654_s2 = scalar_lea.hbm %s709_s1, %s289_s19  ;;  %s173_s21 = scalar_lea.sflag [#allocation4], %s640_s14 }
  0x42   : > { %s401_s10 = scalar_lea.vmem %s656_s29, 128  ;;  %p718_p9 = scmp.ne.s32.totalorder %s713_s22, 0 }
  0x43   : > { %171 = vst [vmem:[%s159_s28] sm:$0xff] %v169_v2  ;;  %p402_p8 = scmp.ne.s32.totalorder %s656_s29, %s401_s10  ;;  %s502_s9 = smov [#allocation5]  }
  0x44   : > { %s405_s4 = sshll.u32 %s502_s9, 4  ;;  %s406_s4 = int_to_ptr.vmem [resolvable:$false] %s405_s4 }
  0x45   : > { %p403_p12 = pnand %p402_p8, %p718_p9  ;;  %s407_s5 = scalar_lea.vmem %s406_s4, 256 }
  0x46   : > { %p408_p7 = scmp.lt.s32.totalorder %s656_s29, %s406_s4  ;;  %p409_p13 = scmp.lt.s32.totalorder %s407_s5, %s401_s10 }
  0x47   : > { %p404_p0 = pneg %p403_p12 }
  0x48   : > { %p410_p4 = por %p409_p13, %p408_p7 }
  0x4a   : > { %p411_p6 = pnand %p410_p4, %p404_p0 }
  0x4c   : > { %414 = shalt.err (!%p411_p6)
}
  0x4d   : > { %s415_s14 = scalar_lea.hbm %s654_s2, 128  ;;  %s419_s24 = scalar_lea.hbm %s709_s1, 512 }
  0x4e   : > { %p416_p3 = scmp.ne.s32.totalorder %s654_s2, %s415_s14  ;;  %p420_p1 = scmp.lt.u32.totalorder %s654_s2, %s709_s1 }
  0x4f   : > { %p421_p2 = scmp.lt.u32.totalorder %s419_s24, %s415_s14  ;;  %p423_p8 = scmp.lt.u32.totalorder %s415_s14, %s654_s2 }
  0x50   : > { %p417_p10 = pnand %p416_p3, %p718_p9 }
  0x51   : > { %p422_p5 = por %p421_p2, %p420_p1 }
  0x52   : > { %p418_p11 = pneg %p417_p10 }
  0x53   : > { %p424_p12 = por %p423_p8, %p422_p5 }
  0x55   : > { %p425_p0 = pnand %p424_p12, %p418_p11 }
  0x57   : > { %428 = shalt.err (!%p425_p0)
}
  0x58   : > { %294 = dma.vmem_to_hbm [thread:$0]  (%p718_p9), %s656_s29, 128, %s654_s2, %s173_s21  }
  0x59 PF: > { %p305_p7 = scmp.ge.s32.totalorder %s499_s13, 2  ;;  %s200_s18 = sand.u32 1, %s471_s6  }
  0x5a   : > { %p719_p13 = scmp.ne.s32.totalorder %s714_s25, 0  ;;  %s201_s19 = scalar_lea.sflag [#allocation4], %s200_s18 }
  0x5c   : > { %p301_p4 = pnand %p305_p7, %p719_p13 }
  0x5e   : > { %466 = dma.done.wait (!%p301_p4), %s201_s19, 128  }
  0x5f   : > { %468 = vsyncadd (!%p301_p4), %s201_s19, 4294967168  ;;  %s17_s13 = sadd.s32 1, %s499_s13   ;;  %s720_s6 = smov %s475_s7 }
  0x60   : > { %p14_p6 = scmp.ge.s32.totalorder %s17_s13, 6   ;;  %s721_s7 = smov %s479_s8 }
  0x61   : > { %s722_s8 = smov %s591_s27  ;;  %s723_s9 = smov %s491_s11 }
  0x62   : > { %s724_s10 = smov %s495_s12  ;;  %s725_s11 = smov %s728_s16 }
  0x63   : > { %s726_s12 = smov %s732_s17  ;;  %16 = sbr.rel (!%p14_p6) target bundleno = 7 (0x7), region = 73 }
  0x6a   :  { %206 = vsyncpa [#allocation3], 1 }
  0x6b   :  { %208 = vsyncpa [#allocation3 + $0x1], 1 }
  0x6c   :  { %209 = vsyncpa [#allocation4], 1 }
  0x6d   :  { %211 = vsyncpa [#allocation4 + $0x1], 1 }

</bundles_post_ra>
